<compile_context>
chip_gen: v7x
topology: tpu7x:2x2x1
jax: 0.10.0
libtpu: 0.0.40
codegen_flags: <defaults>
</compile_context>

<pallas_src>
import functools
import math

import jax
import jax.numpy as jnp
from jax.experimental import pallas as pl
from jax.experimental.pallas import tpu as pltpu


# ---------------------------------------------------------------------------
# Fused per-layer kernel
# ---------------------------------------------------------------------------

def _encoder_layer_kernel(x_ref, wqkv_ref, bqkv_ref, wo_ref, bo_ref,
                          g1_ref, be1_ref, wf1_ref, bf1_ref, wf2_ref, bf2_ref,
                          g2_ref, be2_ref, o_ref, *, n_heads, eps, scale):
    x = x_ref[0]                                          # [L, D] f32
    L, D = x.shape
    E = D // n_heads

    # ---- fused QKV projection: one [L,D] x [D,3D] matmul (bf16 in, f32 acc)
    qkv = jnp.dot(x.astype(jnp.bfloat16), wqkv_ref[...],
                  preferred_element_type=jnp.float32) + bqkv_ref[...]
    q, k, v = qkv[:, :D], qkv[:, D:2 * D], qkv[:, 2 * D:]

    # ---- multi-head full (non-causal) self-attention, all heads in one step
    outs = []
    for h in range(n_heads):                              # static unroll
        sl = slice(h * E, (h + 1) * E)
        qh = q[:, sl].astype(jnp.bfloat16)
        kh = k[:, sl].astype(jnp.bfloat16)
        vh = v[:, sl].astype(jnp.bfloat16)
        s = jnp.dot(qh, kh.T, preferred_element_type=jnp.float32) * scale
        m = jnp.max(s, axis=-1, keepdims=True)
        p = jnp.exp(s - m)
        denom = jnp.sum(p, axis=-1, keepdims=True)
        oh = jnp.dot(p.astype(jnp.bfloat16), vh,
                     preferred_element_type=jnp.float32)
        # normalize AFTER the PV matmul: [L,1] EUP reciprocal + [L,E] multiply
        outs.append(oh * pl.reciprocal(denom, approx=True))
    attn_out = jnp.concatenate(outs, axis=-1)             # [L, D] f32

    # ---- output projection + residual + LayerNorm1 (fused epilogue, f32)
    proj = jnp.dot(attn_out.astype(jnp.bfloat16), wo_ref[...],
                   preferred_element_type=jnp.float32) + bo_ref[...]
    z = x + proj
    mu = jnp.mean(z, axis=-1, keepdims=True)
    var = jnp.mean((z - mu) ** 2, axis=-1, keepdims=True)    # biased, like torch
    y1 = (z - mu) * jax.lax.rsqrt(var + eps) * g1_ref[...] + be1_ref[...]

    # ---- FFN: conv1(kernel=1) -> ReLU -> conv2(kernel=1)
    hdn = jnp.dot(y1.astype(jnp.bfloat16), wf1_ref[...],
                  preferred_element_type=jnp.float32) + bf1_ref[...]
    hdn = jnp.maximum(hdn, 0.0)
    ffn = jnp.dot(hdn.astype(jnp.bfloat16), wf2_ref[...],
                  preferred_element_type=jnp.float32) + bf2_ref[...]

    # ---- residual + LayerNorm2 (fused epilogue)
    z2 = y1 + ffn
    mu2 = jnp.mean(z2, axis=-1, keepdims=True)
    var2 = jnp.mean((z2 - mu2) ** 2, axis=-1, keepdims=True)
    o_ref[0] = ((z2 - mu2) * jax.lax.rsqrt(var2 + eps)
                * g2_ref[...] + be2_ref[...]).astype(o_ref.dtype)


def encoder_layer_forward(x, p, n_heads, eps=1e-5):
    """EncoderLayer forward; returns (out, None) like the PyTorch module."""
    B, L, D = x.shape
    d_ff = p["wf1"].shape[1]
    scale = 1.0 / math.sqrt(D // n_heads)
    kernel = functools.partial(_encoder_layer_kernel,
                               n_heads=n_heads, eps=eps, scale=scale)
    whole = lambda b: (0, 0)                              # shared weight blocks
    out = pl.pallas_call(
        kernel,
        out_shape=jax.ShapeDtypeStruct((B, L, D), jnp.float32),
        grid=(B,),
        in_specs=[
            pl.BlockSpec((1, L, D), lambda b: (b, 0, 0)),   # x (per-batch tile)
            pl.BlockSpec((D, 3 * D), whole),                # wqkv  (bf16)
            pl.BlockSpec((1, 3 * D), whole),                # bqkv
            pl.BlockSpec((D, D), whole),                    # wo    (bf16)
            pl.BlockSpec((1, D), whole),                    # bo
            pl.BlockSpec((1, D), whole),                    # norm1 gamma
            pl.BlockSpec((1, D), whole),                    # norm1 beta
            pl.BlockSpec((D, d_ff), whole),                 # conv1 w (bf16)
            pl.BlockSpec((1, d_ff), whole),                 # conv1 b
            pl.BlockSpec((d_ff, D), whole),                 # conv2 w (bf16)
            pl.BlockSpec((1, D), whole),                    # conv2 b
            pl.BlockSpec((1, D), whole),                    # norm2 gamma
            pl.BlockSpec((1, D), whole),                    # norm2 beta
        ],
        out_specs=pl.BlockSpec((1, L, D), lambda b: (b, 0, 0)),
        compiler_params=pltpu.CompilerParams(
            dimension_semantics=("parallel",)),             # batch across TCs
    )(x, p["wqkv"], p["bqkv"], p["wo"], p["bo"],
      p["g1"], p["b1"], p["wf1"], p["bf1"], p["wf2"], p["bf2"],
      p["g2"], p["b2"])
    return out, None


# ---------------------------------------------------------------------------
# Deterministic parameter init (trunc-normal-ish weights, zero biases, LN=1/0)
# ---------------------------------------------------------------------------

def init_params(key, d_model, d_ff, std=0.02):
    ks = jax.random.split(key, 4)

    def w(k, din, dout):
        return (std * jax.random.normal(k, (din, dout), jnp.float32)
                ).astype(jnp.bfloat16)

    return dict(
        wqkv=w(ks[0], d_model, 3 * d_model),
        bqkv=jnp.zeros((1, 3 * d_model), jnp.float32),
        wo=w(ks[1], d_model, d_model),
        bo=jnp.zeros((1, d_model), jnp.float32),
        g1=jnp.ones((1, d_model), jnp.float32),
        b1=jnp.zeros((1, d_model), jnp.float32),
        wf1=w(ks[2], d_model, d_ff),
        bf1=jnp.zeros((1, d_ff), jnp.float32),
        wf2=w(ks[3], d_ff, d_model),
        bf2=jnp.zeros((1, d_model), jnp.float32),
        g2=jnp.ones((1, d_model), jnp.float32),
        b2=jnp.zeros((1, d_model), jnp.float32),
    )


# ---------------------------------------------------------------------------

if __name__ == "__main__":
    B, L, d_model, n_heads = 2, 8, 32, 4
    d_ff = 4 * d_model                                    # EncoderLayer default

    key = jax.random.PRNGKey(0)
    kx, kp = jax.random.split(key)
    x = jax.random.normal(kx, (B, L, d_model), jnp.float32)
    params = init_params(kp, d_model, d_ff)

    # TODO(synk): dropout is identity (eval / p=0); use_se defaults to False so
    # the SEMlp/DWConv/SqueezeExcite channel-attention branch is never taken.
    out, attn = encoder_layer_forward(x, params, n_heads)
    out = jax.block_until_ready(out)
    assert out.shape == (B, L, d_model), out.shape
    assert bool(jnp.all(jnp.isfinite(out)))
    print("KERNEL_OK")
</pallas_src>

<mosaic_0001>
module attributes {stable_mosaic.version = 11 : i64} {
  func.func @_encoder_layer_kernel(%arg0: i32, %arg1: memref<1x8x32xf32, #tpu.memory_space<vmem>>, %arg2: memref<32x96xbf16, #tpu.memory_space<vmem>>, %arg3: memref<1x96xf32, #tpu.memory_space<vmem>>, %arg4: memref<32x32xbf16, #tpu.memory_space<vmem>>, %arg5: memref<1x32xf32, #tpu.memory_space<vmem>>, %arg6: memref<1x32xf32, #tpu.memory_space<vmem>>, %arg7: memref<1x32xf32, #tpu.memory_space<vmem>>, %arg8: memref<32x128xbf16, #tpu.memory_space<vmem>>, %arg9: memref<1x128xf32, #tpu.memory_space<vmem>>, %arg10: memref<128x32xbf16, #tpu.memory_space<vmem>>, %arg11: memref<1x32xf32, #tpu.memory_space<vmem>>, %arg12: memref<1x32xf32, #tpu.memory_space<vmem>>, %arg13: memref<1x32xf32, #tpu.memory_space<vmem>>, %arg14: memref<1x8x32xf32, #tpu.memory_space<vmem>>) attributes {dimension_semantics = [#tpu.dimension_semantics<parallel>], iteration_bounds = array<i64: 2>, scalar_prefetch = 0 : i64, scratch_operands = 0 : i64, tpu.core_type = #tpu.core_type<tc>, window_params = [{transform_indices = @transform_0, window_bounds = array<i64: 1, 8, 32>}, {pipeline_mode = #tpu.pipeline_mode<synchronous>, transform_indices = @transform_1, window_bounds = array<i64: 32, 96>}, {pipeline_mode = #tpu.pipeline_mode<synchronous>, transform_indices = @transform_2, window_bounds = array<i64: 1, 96>}, {pipeline_mode = #tpu.pipeline_mode<synchronous>, transform_indices = @transform_3, window_bounds = array<i64: 32, 32>}, {pipeline_mode = #tpu.pipeline_mode<synchronous>, transform_indices = @transform_4, window_bounds = array<i64: 1, 32>}, {pipeline_mode = #tpu.pipeline_mode<synchronous>, transform_indices = @transform_5, window_bounds = array<i64: 1, 32>}, {pipeline_mode = #tpu.pipeline_mode<synchronous>, transform_indices = @transform_6, window_bounds = array<i64: 1, 32>}, {pipeline_mode = #tpu.pipeline_mode<synchronous>, transform_indices = @transform_7, window_bounds = array<i64: 32, 128>}, {pipeline_mode = #tpu.pipeline_mode<synchronous>, transform_indices = @transform_8, window_bounds = array<i64: 1, 128>}, {pipeline_mode = #tpu.pipeline_mode<synchronous>, transform_indices = @transform_9, window_bounds = array<i64: 128, 32>}, {pipeline_mode = #tpu.pipeline_mode<synchronous>, transform_indices = @transform_10, window_bounds = array<i64: 1, 32>}, {pipeline_mode = #tpu.pipeline_mode<synchronous>, transform_indices = @transform_11, window_bounds = array<i64: 1, 32>}, {pipeline_mode = #tpu.pipeline_mode<synchronous>, transform_indices = @transform_12, window_bounds = array<i64: 1, 32>}, {transform_indices = @transform_13, window_bounds = array<i64: 1, 8, 32>}]} {
    %c0 = arith.constant 0 : index
    %c0_0 = arith.constant 0 : index
    %c0_1 = arith.constant 0 : index
    %0 = vector.load %arg1[%c0, %c0_0, %c0_1] : memref<1x8x32xf32, #tpu.memory_space<vmem>>, vector<1x8x32xf32>
    %1 = vector.shape_cast %0 : vector<1x8x32xf32> to vector<8x32xf32>
    %2 = arith.truncf %1 : vector<8x32xf32> to vector<8x32xbf16>
    %c0_2 = arith.constant 0 : index
    %c0_3 = arith.constant 0 : index
    %3 = vector.load %arg2[%c0_2, %c0_3] : memref<32x96xbf16, #tpu.memory_space<vmem>>, vector<32x96xbf16>
    %cst = arith.constant dense<0.000000e+00> : vector<8x96xf32>
    %4 = tpu.matmul %2, %3, %cst {dimension_numbers = #tpu.dot_dimension_numbers<[1], [0], [0], [1], [0, 0, 1, 1], [], []>} : vector<8x32xbf16>, vector<32x96xbf16>, vector<8x96xf32> -> vector<8x96xf32>
    %c0_4 = arith.constant 0 : index
    %c0_5 = arith.constant 0 : index
    %5 = vector.load %arg3[%c0_4, %c0_5] : memref<1x96xf32, #tpu.memory_space<vmem>>, vector<1x96xf32>
    %6 = vector.broadcast %5 : vector<1x96xf32> to vector<8x96xf32>
    %7 = arith.addf %4, %6 : vector<8x96xf32>
    %8 = vector.extract_strided_slice %7 {offsets = [0, 0], sizes = [8, 32], strides = [1, 1]} : vector<8x96xf32> to vector<8x32xf32>
    %9 = vector.extract_strided_slice %7 {offsets = [0, 32], sizes = [8, 32], strides = [1, 1]} : vector<8x96xf32> to vector<8x32xf32>
    %10 = vector.extract_strided_slice %7 {offsets = [0, 64], sizes = [8, 32], strides = [1, 1]} : vector<8x96xf32> to vector<8x32xf32>
    %11 = vector.extract_strided_slice %8 {offsets = [0, 0], sizes = [8, 8], strides = [1, 1]} : vector<8x32xf32> to vector<8x8xf32>
    %12 = arith.truncf %11 : vector<8x8xf32> to vector<8x8xbf16>
    %13 = vector.extract_strided_slice %9 {offsets = [0, 0], sizes = [8, 8], strides = [1, 1]} : vector<8x32xf32> to vector<8x8xf32>
    %14 = arith.truncf %13 : vector<8x8xf32> to vector<8x8xbf16>
    %15 = vector.extract_strided_slice %10 {offsets = [0, 0], sizes = [8, 8], strides = [1, 1]} : vector<8x32xf32> to vector<8x8xf32>
    %16 = arith.truncf %15 : vector<8x8xf32> to vector<8x8xbf16>
    %17 = tpu.transpose %14, [1, 0] : vector<8x8xbf16> -> vector<8x8xbf16>
    %cst_6 = arith.constant dense<0.000000e+00> : vector<8x8xf32>
    %18 = tpu.matmul %12, %17, %cst_6 {dimension_numbers = #tpu.dot_dimension_numbers<[1], [0], [0], [1], [0, 0, 1, 1], [], []>} : vector<8x8xbf16>, vector<8x8xbf16>, vector<8x8xf32> -> vector<8x8xf32>
    %cst_7 = arith.constant 0.353553385 : f32
    %19 = vector.broadcast %cst_7 : f32 to vector<8x8xf32>
    %20 = arith.mulf %18, %19 : vector<8x8xf32>
    %cst_8 = arith.constant dense<0xFF800000> : vector<8xf32>
    %21 = vector.multi_reduction <maximumf>, %20, %cst_8 [1] : vector<8x8xf32> to vector<8xf32>
    %22 = vector.shape_cast %21 : vector<8xf32> to vector<8x1xf32>
    %23 = vector.broadcast %22 : vector<8x1xf32> to vector<8x8xf32>
    %24 = arith.subf %20, %23 : vector<8x8xf32>
    %25 = math.exp %24 : vector<8x8xf32>
    %cst_9 = arith.constant dense<0.000000e+00> : vector<8xf32>
    %26 = vector.multi_reduction <add>, %25, %cst_9 [1] : vector<8x8xf32> to vector<8xf32>
    %27 = vector.shape_cast %26 : vector<8xf32> to vector<8x1xf32>
    %28 = arith.truncf %25 : vector<8x8xf32> to vector<8x8xbf16>
    %cst_10 = arith.constant dense<0.000000e+00> : vector<8x8xf32>
    %29 = tpu.matmul %28, %16, %cst_10 {dimension_numbers = #tpu.dot_dimension_numbers<[1], [0], [0], [1], [0, 0, 1, 1], [], []>} : vector<8x8xbf16>, vector<8x8xbf16>, vector<8x8xf32> -> vector<8x8xf32>
    %30 = tpu.reciprocal %27 {approx = true} : vector<8x1xf32> -> vector<8x1xf32>
    %31 = vector.broadcast %30 : vector<8x1xf32> to vector<8x8xf32>
    %32 = arith.mulf %29, %31 : vector<8x8xf32>
    %33 = vector.extract_strided_slice %8 {offsets = [0, 8], sizes = [8, 8], strides = [1, 1]} : vector<8x32xf32> to vector<8x8xf32>
    %34 = arith.truncf %33 : vector<8x8xf32> to vector<8x8xbf16>
    %35 = vector.extract_strided_slice %9 {offsets = [0, 8], sizes = [8, 8], strides = [1, 1]} : vector<8x32xf32> to vector<8x8xf32>
    %36 = arith.truncf %35 : vector<8x8xf32> to vector<8x8xbf16>
    %37 = vector.extract_strided_slice %10 {offsets = [0, 8], sizes = [8, 8], strides = [1, 1]} : vector<8x32xf32> to vector<8x8xf32>
    %38 = arith.truncf %37 : vector<8x8xf32> to vector<8x8xbf16>
    %39 = tpu.transpose %36, [1, 0] : vector<8x8xbf16> -> vector<8x8xbf16>
    %cst_11 = arith.constant dense<0.000000e+00> : vector<8x8xf32>
    %40 = tpu.matmul %34, %39, %cst_11 {dimension_numbers = #tpu.dot_dimension_numbers<[1], [0], [0], [1], [0, 0, 1, 1], [], []>} : vector<8x8xbf16>, vector<8x8xbf16>, vector<8x8xf32> -> vector<8x8xf32>
    %cst_12 = arith.constant 0.353553385 : f32
    %41 = vector.broadcast %cst_12 : f32 to vector<8x8xf32>
    %42 = arith.mulf %40, %41 : vector<8x8xf32>
    %cst_13 = arith.constant dense<0xFF800000> : vector<8xf32>
    %43 = vector.multi_reduction <maximumf>, %42, %cst_13 [1] : vector<8x8xf32> to vector<8xf32>
    %44 = vector.shape_cast %43 : vector<8xf32> to vector<8x1xf32>
    %45 = vector.broadcast %44 : vector<8x1xf32> to vector<8x8xf32>
    %46 = arith.subf %42, %45 : vector<8x8xf32>
    %47 = math.exp %46 : vector<8x8xf32>
    %cst_14 = arith.constant dense<0.000000e+00> : vector<8xf32>
    %48 = vector.multi_reduction <add>, %47, %cst_14 [1] : vector<8x8xf32> to vector<8xf32>
    %49 = vector.shape_cast %48 : vector<8xf32> to vector<8x1xf32>
    %50 = arith.truncf %47 : vector<8x8xf32> to vector<8x8xbf16>
    %cst_15 = arith.constant dense<0.000000e+00> : vector<8x8xf32>
    %51 = tpu.matmul %50, %38, %cst_15 {dimension_numbers = #tpu.dot_dimension_numbers<[1], [0], [0], [1], [0, 0, 1, 1], [], []>} : vector<8x8xbf16>, vector<8x8xbf16>, vector<8x8xf32> -> vector<8x8xf32>
    %52 = tpu.reciprocal %49 {approx = true} : vector<8x1xf32> -> vector<8x1xf32>
    %53 = vector.broadcast %52 : vector<8x1xf32> to vector<8x8xf32>
    %54 = arith.mulf %51, %53 : vector<8x8xf32>
    %55 = vector.extract_strided_slice %8 {offsets = [0, 16], sizes = [8, 8], strides = [1, 1]} : vector<8x32xf32> to vector<8x8xf32>
    %56 = arith.truncf %55 : vector<8x8xf32> to vector<8x8xbf16>
    %57 = vector.extract_strided_slice %9 {offsets = [0, 16], sizes = [8, 8], strides = [1, 1]} : vector<8x32xf32> to vector<8x8xf32>
    %58 = arith.truncf %57 : vector<8x8xf32> to vector<8x8xbf16>
    %59 = vector.extract_strided_slice %10 {offsets = [0, 16], sizes = [8, 8], strides = [1, 1]} : vector<8x32xf32> to vector<8x8xf32>
    %60 = arith.truncf %59 : vector<8x8xf32> to vector<8x8xbf16>
    %61 = tpu.transpose %58, [1, 0] : vector<8x8xbf16> -> vector<8x8xbf16>
    %cst_16 = arith.constant dense<0.000000e+00> : vector<8x8xf32>
    %62 = tpu.matmul %56, %61, %cst_16 {dimension_numbers = #tpu.dot_dimension_numbers<[1], [0], [0], [1], [0, 0, 1, 1], [], []>} : vector<8x8xbf16>, vector<8x8xbf16>, vector<8x8xf32> -> vector<8x8xf32>
    %cst_17 = arith.constant 0.353553385 : f32
    %63 = vector.broadcast %cst_17 : f32 to vector<8x8xf32>
    %64 = arith.mulf %62, %63 : vector<8x8xf32>
    %cst_18 = arith.constant dense<0xFF800000> : vector<8xf32>
    %65 = vector.multi_reduction <maximumf>, %64, %cst_18 [1] : vector<8x8xf32> to vector<8xf32>
    %66 = vector.shape_cast %65 : vector<8xf32> to vector<8x1xf32>
    %67 = vector.broadcast %66 : vector<8x1xf32> to vector<8x8xf32>
    %68 = arith.subf %64, %67 : vector<8x8xf32>
    %69 = math.exp %68 : vector<8x8xf32>
    %cst_19 = arith.constant dense<0.000000e+00> : vector<8xf32>
    %70 = vector.multi_reduction <add>, %69, %cst_19 [1] : vector<8x8xf32> to vector<8xf32>
    %71 = vector.shape_cast %70 : vector<8xf32> to vector<8x1xf32>
    %72 = arith.truncf %69 : vector<8x8xf32> to vector<8x8xbf16>
    %cst_20 = arith.constant dense<0.000000e+00> : vector<8x8xf32>
    %73 = tpu.matmul %72, %60, %cst_20 {dimension_numbers = #tpu.dot_dimension_numbers<[1], [0], [0], [1], [0, 0, 1, 1], [], []>} : vector<8x8xbf16>, vector<8x8xbf16>, vector<8x8xf32> -> vector<8x8xf32>
    %74 = tpu.reciprocal %71 {approx = true} : vector<8x1xf32> -> vector<8x1xf32>
    %75 = vector.broadcast %74 : vector<8x1xf32> to vector<8x8xf32>
    %76 = arith.mulf %73, %75 : vector<8x8xf32>
    %77 = vector.extract_strided_slice %8 {offsets = [0, 24], sizes = [8, 8], strides = [1, 1]} : vector<8x32xf32> to vector<8x8xf32>
    %78 = arith.truncf %77 : vector<8x8xf32> to vector<8x8xbf16>
    %79 = vector.extract_strided_slice %9 {offsets = [0, 24], sizes = [8, 8], strides = [1, 1]} : vector<8x32xf32> to vector<8x8xf32>
    %80 = arith.truncf %79 : vector<8x8xf32> to vector<8x8xbf16>
    %81 = vector.extract_strided_slice %10 {offsets = [0, 24], sizes = [8, 8], strides = [1, 1]} : vector<8x32xf32> to vector<8x8xf32>
    %82 = arith.truncf %81 : vector<8x8xf32> to vector<8x8xbf16>
    %83 = tpu.transpose %80, [1, 0] : vector<8x8xbf16> -> vector<8x8xbf16>
    %cst_21 = arith.constant dense<0.000000e+00> : vector<8x8xf32>
    %84 = tpu.matmul %78, %83, %cst_21 {dimension_numbers = #tpu.dot_dimension_numbers<[1], [0], [0], [1], [0, 0, 1, 1], [], []>} : vector<8x8xbf16>, vector<8x8xbf16>, vector<8x8xf32> -> vector<8x8xf32>
    %cst_22 = arith.constant 0.353553385 : f32
    %85 = vector.broadcast %cst_22 : f32 to vector<8x8xf32>
    %86 = arith.mulf %84, %85 : vector<8x8xf32>
    %cst_23 = arith.constant dense<0xFF800000> : vector<8xf32>
    %87 = vector.multi_reduction <maximumf>, %86, %cst_23 [1] : vector<8x8xf32> to vector<8xf32>
    %88 = vector.shape_cast %87 : vector<8xf32> to vector<8x1xf32>
    %89 = vector.broadcast %88 : vector<8x1xf32> to vector<8x8xf32>
    %90 = arith.subf %86, %89 : vector<8x8xf32>
    %91 = math.exp %90 : vector<8x8xf32>
    %cst_24 = arith.constant dense<0.000000e+00> : vector<8xf32>
    %92 = vector.multi_reduction <add>, %91, %cst_24 [1] : vector<8x8xf32> to vector<8xf32>
    %93 = vector.shape_cast %92 : vector<8xf32> to vector<8x1xf32>
    %94 = arith.truncf %91 : vector<8x8xf32> to vector<8x8xbf16>
    %cst_25 = arith.constant dense<0.000000e+00> : vector<8x8xf32>
    %95 = tpu.matmul %94, %82, %cst_25 {dimension_numbers = #tpu.dot_dimension_numbers<[1], [0], [0], [1], [0, 0, 1, 1], [], []>} : vector<8x8xbf16>, vector<8x8xbf16>, vector<8x8xf32> -> vector<8x8xf32>
    %96 = tpu.reciprocal %93 {approx = true} : vector<8x1xf32> -> vector<8x1xf32>
    %97 = vector.broadcast %96 : vector<8x1xf32> to vector<8x8xf32>
    %98 = arith.mulf %95, %97 : vector<8x8xf32>
    %99 = tpu.concatenate %32, %54, %76, %98 in 1 : vector<8x8xf32>, vector<8x8xf32>, vector<8x8xf32>, vector<8x8xf32> -> vector<8x32xf32>
    %100 = arith.truncf %99 : vector<8x32xf32> to vector<8x32xbf16>
    %c0_26 = arith.constant 0 : index
    %c0_27 = arith.constant 0 : index
    %101 = vector.load %arg4[%c0_26, %c0_27] : memref<32x32xbf16, #tpu.memory_space<vmem>>, vector<32x32xbf16>
    %cst_28 = arith.constant dense<0.000000e+00> : vector<8x32xf32>
    %102 = tpu.matmul %100, %101, %cst_28 {dimension_numbers = #tpu.dot_dimension_numbers<[1], [0], [0], [1], [0, 0, 1, 1], [], []>} : vector<8x32xbf16>, vector<32x32xbf16>, vector<8x32xf32> -> vector<8x32xf32>
    %c0_29 = arith.constant 0 : index
    %c0_30 = arith.constant 0 : index
    %103 = vector.load %arg5[%c0_29, %c0_30] : memref<1x32xf32, #tpu.memory_space<vmem>>, vector<1x32xf32>
    %104 = vector.broadcast %103 : vector<1x32xf32> to vector<8x32xf32>
    %105 = arith.addf %102, %104 : vector<8x32xf32>
    %106 = arith.addf %1, %105 : vector<8x32xf32>
    %cst_31 = arith.constant dense<0.000000e+00> : vector<8xf32>
    %107 = vector.multi_reduction <add>, %106, %cst_31 [1] : vector<8x32xf32> to vector<8xf32>
    %108 = vector.shape_cast %107 : vector<8xf32> to vector<8x1xf32>
    %cst_32 = arith.constant 3.200000e+01 : f32
    %109 = vector.broadcast %cst_32 : f32 to vector<8x1xf32>
    %110 = arith.divf %108, %109 : vector<8x1xf32>
    %111 = vector.broadcast %110 : vector<8x1xf32> to vector<8x32xf32>
    %112 = arith.subf %106, %111 : vector<8x32xf32>
    %113 = arith.mulf %112, %112 : vector<8x32xf32>
    %cst_33 = arith.constant dense<0.000000e+00> : vector<8xf32>
    %114 = vector.multi_reduction <add>, %113, %cst_33 [1] : vector<8x32xf32> to vector<8xf32>
    %115 = vector.shape_cast %114 : vector<8xf32> to vector<8x1xf32>
    %cst_34 = arith.constant 3.200000e+01 : f32
    %116 = vector.broadcast %cst_34 : f32 to vector<8x1xf32>
    %117 = arith.divf %115, %116 : vector<8x1xf32>
    %118 = vector.broadcast %110 : vector<8x1xf32> to vector<8x32xf32>
    %119 = arith.subf %106, %118 : vector<8x32xf32>
    %cst_35 = arith.constant 9.99999974E-6 : f32
    %120 = vector.broadcast %cst_35 : f32 to vector<8x1xf32>
    %121 = arith.addf %117, %120 : vector<8x1xf32>
    %122 = math.rsqrt %121 : vector<8x1xf32>
    %123 = vector.broadcast %122 : vector<8x1xf32> to vector<8x32xf32>
    %124 = arith.mulf %119, %123 : vector<8x32xf32>
    %c0_36 = arith.constant 0 : index
    %c0_37 = arith.constant 0 : index
    %125 = vector.load %arg6[%c0_36, %c0_37] : memref<1x32xf32, #tpu.memory_space<vmem>>, vector<1x32xf32>
    %126 = vector.broadcast %125 : vector<1x32xf32> to vector<8x32xf32>
    %127 = arith.mulf %124, %126 : vector<8x32xf32>
    %c0_38 = arith.constant 0 : index
    %c0_39 = arith.constant 0 : index
    %128 = vector.load %arg7[%c0_38, %c0_39] : memref<1x32xf32, #tpu.memory_space<vmem>>, vector<1x32xf32>
    %129 = vector.broadcast %128 : vector<1x32xf32> to vector<8x32xf32>
    %130 = arith.addf %127, %129 : vector<8x32xf32>
    %131 = arith.truncf %130 : vector<8x32xf32> to vector<8x32xbf16>
    %c0_40 = arith.constant 0 : index
    %c0_41 = arith.constant 0 : index
    %132 = vector.load %arg8[%c0_40, %c0_41] : memref<32x128xbf16, #tpu.memory_space<vmem>>, vector<32x128xbf16>
    %cst_42 = arith.constant dense<0.000000e+00> : vector<8x128xf32>
    %133 = tpu.matmul %131, %132, %cst_42 {dimension_numbers = #tpu.dot_dimension_numbers<[1], [0], [0], [1], [0, 0, 1, 1], [], []>} : vector<8x32xbf16>, vector<32x128xbf16>, vector<8x128xf32> -> vector<8x128xf32>
    %c0_43 = arith.constant 0 : index
    %c0_44 = arith.constant 0 : index
    %134 = vector.load %arg9[%c0_43, %c0_44] : memref<1x128xf32, #tpu.memory_space<vmem>>, vector<1x128xf32>
    %135 = vector.broadcast %134 : vector<1x128xf32> to vector<8x128xf32>
    %136 = arith.addf %133, %135 : vector<8x128xf32>
    %cst_45 = arith.constant 0.000000e+00 : f32
    %137 = vector.broadcast %cst_45 : f32 to vector<8x128xf32>
    %138 = arith.maximumf %136, %137 : vector<8x128xf32>
    %139 = arith.truncf %138 : vector<8x128xf32> to vector<8x128xbf16>
    %c0_46 = arith.constant 0 : index
    %c0_47 = arith.constant 0 : index
    %140 = vector.load %arg10[%c0_46, %c0_47] : memref<128x32xbf16, #tpu.memory_space<vmem>>, vector<128x32xbf16>
    %cst_48 = arith.constant dense<0.000000e+00> : vector<8x32xf32>
    %141 = tpu.matmul %139, %140, %cst_48 {dimension_numbers = #tpu.dot_dimension_numbers<[1], [0], [0], [1], [0, 0, 1, 1], [], []>} : vector<8x128xbf16>, vector<128x32xbf16>, vector<8x32xf32> -> vector<8x32xf32>
    %c0_49 = arith.constant 0 : index
    %c0_50 = arith.constant 0 : index
    %142 = vector.load %arg11[%c0_49, %c0_50] : memref<1x32xf32, #tpu.memory_space<vmem>>, vector<1x32xf32>
    %143 = vector.broadcast %142 : vector<1x32xf32> to vector<8x32xf32>
    %144 = arith.addf %141, %143 : vector<8x32xf32>
    %145 = arith.addf %130, %144 : vector<8x32xf32>
    %cst_51 = arith.constant dense<0.000000e+00> : vector<8xf32>
    %146 = vector.multi_reduction <add>, %145, %cst_51 [1] : vector<8x32xf32> to vector<8xf32>
    %147 = vector.shape_cast %146 : vector<8xf32> to vector<8x1xf32>
    %cst_52 = arith.constant 3.200000e+01 : f32
    %148 = vector.broadcast %cst_52 : f32 to vector<8x1xf32>
    %149 = arith.divf %147, %148 : vector<8x1xf32>
    %150 = vector.broadcast %149 : vector<8x1xf32> to vector<8x32xf32>
    %151 = arith.subf %145, %150 : vector<8x32xf32>
    %152 = arith.mulf %151, %151 : vector<8x32xf32>
    %cst_53 = arith.constant dense<0.000000e+00> : vector<8xf32>
    %153 = vector.multi_reduction <add>, %152, %cst_53 [1] : vector<8x32xf32> to vector<8xf32>
    %154 = vector.shape_cast %153 : vector<8xf32> to vector<8x1xf32>
    %cst_54 = arith.constant 3.200000e+01 : f32
    %155 = vector.broadcast %cst_54 : f32 to vector<8x1xf32>
    %156 = arith.divf %154, %155 : vector<8x1xf32>
    %157 = vector.broadcast %149 : vector<8x1xf32> to vector<8x32xf32>
    %158 = arith.subf %145, %157 : vector<8x32xf32>
    %cst_55 = arith.constant 9.99999974E-6 : f32
    %159 = vector.broadcast %cst_55 : f32 to vector<8x1xf32>
    %160 = arith.addf %156, %159 : vector<8x1xf32>
    %161 = math.rsqrt %160 : vector<8x1xf32>
    %162 = vector.broadcast %161 : vector<8x1xf32> to vector<8x32xf32>
    %163 = arith.mulf %158, %162 : vector<8x32xf32>
    %c0_56 = arith.constant 0 : index
    %c0_57 = arith.constant 0 : index
    %164 = vector.load %arg12[%c0_56, %c0_57] : memref<1x32xf32, #tpu.memory_space<vmem>>, vector<1x32xf32>
    %165 = vector.broadcast %164 : vector<1x32xf32> to vector<8x32xf32>
    %166 = arith.mulf %163, %165 : vector<8x32xf32>
    %c0_58 = arith.constant 0 : index
    %c0_59 = arith.constant 0 : index
    %167 = vector.load %arg13[%c0_58, %c0_59] : memref<1x32xf32, #tpu.memory_space<vmem>>, vector<1x32xf32>
    %168 = vector.broadcast %167 : vector<1x32xf32> to vector<8x32xf32>
    %169 = arith.addf %166, %168 : vector<8x32xf32>
    %c0_60 = arith.constant 0 : index
    %c0_61 = arith.constant 0 : index
    %c0_62 = arith.constant 0 : index
    %170 = vector.load %arg14[%c0_60, %c0_61, %c0_62] : memref<1x8x32xf32, #tpu.memory_space<vmem>>, vector<1x8x32xf32>
    %171 = vector.shape_cast %170 : vector<1x8x32xf32> to vector<8x32xf32>
    %172 = vector.shape_cast %169 : vector<8x32xf32> to vector<1x8x32xf32>
    tpu.vector_store %arg14[%c0_60, %c0_61, %c0_62], %172 {strides = array<i32>} : memref<1x8x32xf32, #tpu.memory_space<vmem>>, vector<1x8x32xf32>,
    return
  }
  func.func @transform_0(%arg0: i32) -> (i32, i32, i32) {
    %c0_i32 = arith.constant 0 : i32
    %c0_i32_0 = arith.constant 0 : i32
    %c0_i32_1 = arith.constant 0 : i32
    return %arg0, %c0_i32, %c0_i32_0 : i32, i32, i32
  }
  func.func @transform_1(%arg0: i32) -> (i32, i32) {
    %c0_i32 = arith.constant 0 : i32
    %c0_i32_0 = arith.constant 0 : i32
    %c0_i32_1 = arith.constant 0 : i32
    return %c0_i32, %c0_i32_0 : i32, i32
  }
  func.func @transform_2(%arg0: i32) -> (i32, i32) {
    %c0_i32 = arith.constant 0 : i32
    %c0_i32_0 = arith.constant 0 : i32
    %c0_i32_1 = arith.constant 0 : i32
    return %c0_i32, %c0_i32_0 : i32, i32
  }
  func.func @transform_3(%arg0: i32) -> (i32, i32) {
    %c0_i32 = arith.constant 0 : i32
    %c0_i32_0 = arith.constant 0 : i32
    %c0_i32_1 = arith.constant 0 : i32
    return %c0_i32, %c0_i32_0 : i32, i32
  }
  func.func @transform_4(%arg0: i32) -> (i32, i32) {
    %c0_i32 = arith.constant 0 : i32
    %c0_i32_0 = arith.constant 0 : i32
    %c0_i32_1 = arith.constant 0 : i32
    return %c0_i32, %c0_i32_0 : i32, i32
  }
  func.func @transform_5(%arg0: i32) -> (i32, i32) {
    %c0_i32 = arith.constant 0 : i32
    %c0_i32_0 = arith.constant 0 : i32
    %c0_i32_1 = arith.constant 0 : i32
    return %c0_i32, %c0_i32_0 : i32, i32
  }
  func.func @transform_6(%arg0: i32) -> (i32, i32) {
    %c0_i32 = arith.constant 0 : i32
    %c0_i32_0 = arith.constant 0 : i32
    %c0_i32_1 = arith.constant 0 : i32
    return %c0_i32, %c0_i32_0 : i32, i32
  }
  func.func @transform_7(%arg0: i32) -> (i32, i32) {
    %c0_i32 = arith.constant 0 : i32
    %c0_i32_0 = arith.constant 0 : i32
    %c0_i32_1 = arith.constant 0 : i32
    return %c0_i32, %c0_i32_0 : i32, i32
  }
  func.func @transform_8(%arg0: i32) -> (i32, i32) {
    %c0_i32 = arith.constant 0 : i32
    %c0_i32_0 = arith.constant 0 : i32
    %c0_i32_1 = arith.constant 0 : i32
    return %c0_i32, %c0_i32_0 : i32, i32
  }
  func.func @transform_9(%arg0: i32) -> (i32, i32) {
    %c0_i32 = arith.constant 0 : i32
    %c0_i32_0 = arith.constant 0 : i32
    %c0_i32_1 = arith.constant 0 : i32
    return %c0_i32, %c0_i32_0 : i32, i32
  }
  func.func @transform_10(%arg0: i32) -> (i32, i32) {
    %c0_i32 = arith.constant 0 : i32
    %c0_i32_0 = arith.constant 0 : i32
    %c0_i32_1 = arith.constant 0 : i32
    return %c0_i32, %c0_i32_0 : i32, i32
  }
  func.func @transform_11(%arg0: i32) -> (i32, i32) {
    %c0_i32 = arith.constant 0 : i32
    %c0_i32_0 = arith.constant 0 : i32
    %c0_i32_1 = arith.constant 0 : i32
    return %c0_i32, %c0_i32_0 : i32, i32
  }
  func.func @transform_12(%arg0: i32) -> (i32, i32) {
    %c0_i32 = arith.constant 0 : i32
    %c0_i32_0 = arith.constant 0 : i32
    %c0_i32_1 = arith.constant 0 : i32
    return %c0_i32, %c0_i32_0 : i32, i32
  }
  func.func @transform_13(%arg0: i32) -> (i32, i32, i32) {
    %c0_i32 = arith.constant 0 : i32
    %c0_i32_0 = arith.constant 0 : i32
    %c0_i32_1 = arith.constant 0 : i32
    return %arg0, %c0_i32, %c0_i32_0 : i32, i32, i32
  }
}

</mosaic_0001>

<bundles_post_ra>
// kernel: tpu_custom_call.1
= control target key start
LH: loop header
LB: loop body
LE: loop exit
PB: predicated region body
PF: predicated region fallthrough
CT: control target
= control target key end

     0   :  { %s2024_s0 = inlined_call_operand.vmem [shape: f32[2,8,32], index: 0, kind: input, shape index: {}]   ;;  %s2025_s1 = inlined_call_operand.vmem [shape: bf16[32,96], index: 1, kind: input, shape index: {}]   ;;  %s2026_s2 = inlined_call_operand.vmem [shape: f32[1,96], index: 2, kind: input, shape index: {}]   ;;  %s2027_s3 = inlined_call_operand.vmem [shape: bf16[32,32], index: 3, kind: input, shape index: {}]   ;;  %s2028_s4 = inlined_call_operand.vmem [shape: f32[1,32], index: 4, kind: input, shape index: {}]   ;;  %s2029_s5 = inlined_call_operand.vmem [shape: f32[1,32], index: 5, kind: input, shape index: {}]   ;;  %s2030_s6 = inlined_call_operand.vmem [shape: f32[1,32], index: 6, kind: input, shape index: {}]   ;;  %s2031_s7 = inlined_call_operand.vmem [shape: bf16[32,128], index: 7, kind: input, shape index: {}]   ;;  %s2032_s8 = inlined_call_operand.vmem [shape: f32[1,128], index: 8, kind: input, shape index: {}]   ;;  %s2033_s9 = inlined_call_operand.vmem [shape: bf16[128,32], index: 9, kind: input, shape index: {}]   ;;  %s2034_s10 = inlined_call_operand.vmem [shape: f32[1,32], index: 10, kind: input, shape index: {}]   ;;  %s2035_s11 = inlined_call_operand.vmem [shape: f32[1,32], index: 11, kind: input, shape index: {}]   ;;  %s2036_s12 = inlined_call_operand.vmem [shape: f32[1,32], index: 12, kind: input, shape index: {}]   ;;  %s2037_s13 = inlined_call_operand.hbm [shape: f32[2,8,32], index: 13, kind: output, shape index: {}]  }
   0x1   :  { %2038 = sst [smem:[#allocation5_spill]] %s2024_s0 }
   0x2   :  { %2039 = sst [smem:[#allocation6_spill]] %s2025_s1 }
   0x3   :  { %2040 = sst [smem:[#allocation7_spill]] %s2026_s2 }
   0x4   :  { %2041 = sst [smem:[#allocation8_spill]] %s2027_s3 }
   0x5   :  { %18 = vsyncpa [#allocation3], 0 }
   0x6   :  { %20 = vsyncpa [#allocation3 + $0x1], 0  ;;  %s1760_s25 = smov 0   ;;  %s1762_s26 = smov 0  }
   0x7   :  { %s1764_s27 = smov 0   ;;  %s1766_s28 = smov 0  }
   0x8 LB: > { %s1781_s29 = sadd.s32 4294967295, %s1671_s28   ;;  %s1351_s30 = sadd.s32 4294967294, %s1671_s28   ;;  %s1671_s28 = sphi %s1766_s28, %s2051_s28   ;;  %s1667_s27 = sphi %s1764_s27, %s2050_s27   ;;  %s1663_s26 = sphi %s1762_s26, %s2049_s26   ;;  %s1659_s25 = sphi %s1760_s25, %s2048_s25  }
   0x9   : > { %s1785_s14 = sadd.s32 1, %s1671_s28   ;;  %s311_s15 = sadd.s32 1, %s1667_s27 }
   0xa   : > { %s308_s16 = ssub.s32 %s1671_s28, %s1785_s14  ;;  %p321_p0 = scmp.ne.s32.totalorder %s1667_s27, %s1663_s26 }
   0xb   : > { %p309_p1 = scmp.eq.s32.totalorder %s308_s16, 0  ;;  %p322_p2 = scmp.eq.s32.totalorder %s1781_s29, 1 }
   0xc   : > { %p327_p3 = scmp.ne.s32.totalorder %s1663_s26, %s1659_s25  ;;  %p328_p4 = scmp.eq.s32.totalorder %s1351_s30, 1 }
   0xd   : > { %s1796_s17 = scalar_select %p309_p1, %s1667_s27, %s311_s15  }
   0xe   : > { %p1798_p5 = por %p322_p2, %p321_p0  ;;  %p1802_p6 = por %p328_p4, %p327_p3 }
   0xf   : > { %p1354_p7 = scmp.ge.s32.totalorder %s1671_s28, 1  ;;  %p389_p8 = scmp.lt.s32.totalorder %s1671_s28, 3 }
  0x11   : > { %p390_p9 = pnand %p1354_p7, %p389_p8 }
  0x12   : > { %s2044_s1 = sld [smem:[#allocation6_spill]] (!%p390_p9)  ;;  %v1673_v1 = vmov (!%p390_p9), 0.0   ;;  %vm1674_vm0 = vmmov (!%p390_p9), 0   ;;  %p432_p10 = scmp.lt.s32.totalorder (!%p390_p9), %s1781_s29, 1  ;;  %vm462_vm1 = vcmask (!%p390_p9), 261120   ;;  %vm510_vm2 = vcmask (!%p390_p9), 64512  }
  0x13   : > { %393 = sbr.rel (%p390_p9) target bundleno = 2423 (0x977), region = 72  ;;  %1428 = vmatprep.subr.bf16.mxu0 (!%p390_p9), %v1673_v1  ;;  %1448 = vmatprep.subr.bf16.mxu1 (!%p390_p9), %v1673_v1  ;;  %s2045_s0 = sld [smem:[#allocation5_spill]] (!%p390_p9)  ;;  %vm573_vm3 = vcmask (!%p390_p9), 1043456   ;;  %vm965_vm4 = vcmask (!%p390_p9), 130048   ;;  %vm967_vm5 = vcmask (!%p390_p9), 195584  }
  0x14   : > { %1432 = vmatprep.mubr.msk.bf16.mxu0 (!%p390_p9), %vm1674_vm0, %v1673_v1  ;;  %1450 = vmatprep.mubr.msk.bf16.mxu1 (!%p390_p9), %vm1674_vm0, %v1673_v1  ;;  %s2046_s2 = sld [smem:[#allocation7_spill]] (!%p390_p9)  ;;  %s1675_s23 = smov (!%p390_p9), 120  }
  0x15   : > { %s1678_s15 = smov (!%p390_p9), 88   ;;  %s1679_s16 = smov (!%p390_p9), 72  }
  0x16   : > { %s1681_s21 = smov (!%p390_p9), 104   ;;  %s1682_s22 = smov (!%p390_p9), 56  }
  0x17   : > { %s2047_s3 = sld [smem:[#allocation8_spill]] (!%p390_p9) }
  0x18   : > { %v1575_v0 = vld [vmem:[%s2044_s1] sm:$0xff] (!%p390_p9)   ;;  %v1576_v2 = vld [vmem:[%s2044_s1 + $0x8] sm:$0xff] (!%p390_p9)  }
  0x19   : > { %1429 = vmatpush3.bf16.msra.mxu0 (!%p390_p9), %v1575_v0 }
  0x1a   : > { %1430 = vmatprep.subr.bf16.mxu0 %v1673_v1  ;;  %s433_s24 = scalar_select %p432_p10, %s1781_s29, 1  ;;  %v1357_v5 = vld [vmem:[%s2046_s2] ss:$0 sm:$0xff] }
  0x1c   : > { %s1356_s30 = sshll.u32 %s433_s24, 3  ;;  %s1676_s24 = smov 96  }
  0x1d   : > { %1431 = vmatpush3.bf16.msra.mxu0 %v1576_v2  ;;  %s435_s20 = scalar_lea.vmem %s2045_s0, %s1356_s30  ;;  %s1677_s30 = smov 80  }
  0x1e   : > { %1436 = vmatprep.subr.bf16.mxu0 %v1673_v1  ;;  %v1827_v3 = vld [vmem:[%s435_s20] sm:$0xff]  ;;  %s1680_s20 = smov 112  }
  0x1f   : > { %v438_v4 = vpack.c.bf16 %v1827_v3, %v1827_v3 }
  0x21   : > { %1433 = vmatmul.mubr.msk.bf16.vlgmr.msra.gmra.mrb[0].mxu0 %vm462_vm1, %v438_v4 }
  0x22   : > { %1438 = vmatprep.mubr.msk.bf16.mxu0 %vm1674_vm0, %v1673_v1 }
  0xf4   : > { %v500_v6 = vpop.f32.mrb[0].mxu0 }
  0xf5   : > { %v501_v7 = vadd.f32 %v1357_v5, %v500_v6  ;;  %v1434_v8 = vpop.f32.mrb[1].mxu0 }
  0xf6   : > { %v503_v9 = vpop.f32.mrb[2].mxu0 }
  0xf7   : > { %v1837_v10 = vpack.c.bf16 %v501_v7, %v501_v7  ;;  %v1435_v11 = vpop.f32.mrb[3].mxu0 }
  0xf9   : > { %619 = vrot.lane.b32.xlu1 %v1837_v10, %s1675_s23  ;;  %508 = vrot.lane.b32.xlu0 %v1837_v10, %s1676_s24  ;;  %s1683_s23 = smov 64   ;;  %s1684_s24 = smov 40  }
  0xfd   : > { %732 = vrot.lane.b32.xlu1 %v1837_v10, %s1677_s30  ;;  %621 = vrot.lane.b32.xlu0 %v1837_v10, %s1678_s15  ;;  %s1685_s30 = smov 48   ;;  %s1686_s15 = smov 8  }
 0x101   : > { %843 = vrot.lane.b32.xlu1 %v1837_v10, %s1679_s16  ;;  %730 = vrot.lane.b32.xlu0 %v1837_v10, %s1680_s20 }
 0x105   : > { %841 = vrot.lane.b32.xlu0 %v1837_v10, %s1681_s21  ;;  %s1391_s21 = sshll.u32 %s1781_s29, 7  ;;  %s1689_s29 = smov [#allocation2]  }
 0x16b   : > { %v509_v12 = vpop.permute.xlu0 %508  ;;  %v620_v14 = vpop.permute.xlu1 %619 }
 0x16c   : > { %v515_v13 = vsel %vm510_vm2, %v509_v12, 0 }
 0x16d   : > { %1437 = vmatpush3.bf16.xpose.msra.mxu0 %v515_v13 }
 0x16e   : > { %1442 = vmatprep.subr.bf16.mxu0 %v1673_v1 }
 0x16f   : > { %v622_v15 = vpop.permute.xlu0 %621  ;;  %v733_v17 = vpop.permute.xlu1 %732 }
 0x170   : > { %v627_v16 = vsel %vm510_vm2, %v622_v15, 0  ;;  %v738_v18 = vsel %vm510_vm2, %v733_v17, 0 }
 0x171   : > { %1449 = vmatpush3.bf16.xpose.msra.mxu1 %v627_v16 }
 0x172   : > { %1460 = vmatprep.subr.bf16.mxu1 %v1673_v1 }
 0x173   : > { %v844_v19 = vpop.permute.xlu1 %843  ;;  %v731_v20 = vpop.permute.xlu0 %730 }
 0x174   : > { %1439 = vmatmul.mubr.msk.bf16.vlgmr.msra.gmra.mrb[4].mxu0 %vm510_vm2, %v1837_v10  ;;  %v849_v21 = vsel %vm510_vm2, %v844_v19, 0 }
 0x175   : > { %1444 = vmatprep.mubr.msk.bf16.mxu0 %vm1674_vm0, %v1673_v1 }
 0x177   : > { %v842_v22 = vpop.permute.xlu0 %841 }
 0x178   : > { %1451 = vmatmul.mubr.msk.bf16.vlgmr.msra.gmra.mrb[0].mxu1 %vm510_vm2, %v620_v14 }
 0x179   : > { %1461 = vmatpush3.bf16.xpose.msra.mxu1 %v738_v18  ;;  %1462 = vmatprep.mubr.msk.bf16.mxu1 %vm1674_vm0, %v1673_v1 }
 0x17a   : > { %1472 = vmatprep.subr.bf16.mxu1 %v1673_v1 }
 0x180   : > { %1463 = vmatmul.mubr.msk.bf16.vlgmr.msra.gmra.mrb[4].mxu1 %vm510_vm2, %v731_v20 }
 0x181   : > { %1473 = vmatpush3.bf16.xpose.msra.mxu1 %v849_v21  ;;  %1474 = vmatprep.mubr.msk.bf16.mxu1 %vm1674_vm0, %v1673_v1 }
 0x182   : > { %1484 = vmatprep.subr.bf16.mxu1 %v1673_v1 }
 0x188   : > { %1475 = vmatmul.mubr.msk.bf16.vlgmr.msra.gmra.mrb[8].mxu1 %vm510_vm2, %v842_v22 }
 0x189   : > { %1488 = vmatprep.mubr.msk.bf16.mxu1 %vm1674_vm0, %v1673_v1 }
 0x247   : > { %v551_v23 = vpop.f32.mrb[4].mxu0 }
 0x248   : > { %v557_v24 = vmul.f32 0.35355338, %v551_v23  ;;  %v1440_v25 = vpop.f32.mrb[5].mxu0 }
 0x249   : > { %v554_v26 = vpop.f32.mrb[6].mxu0 }
 0x24a   : > { %v1441_v27 = vpop.f32.mrb[7].mxu0  ;;  %v558_v28 = vsel %vm510_vm2, %v557_v24, -inf }
 0x24b   : > { %v663_v29 = vpop.f32.mrb[0].mxu1  ;;  %559 = vmax.xlane.f32.xlu1 %v558_v28 }
 0x24c   : > { %v669_v30 = vmul.f32 0.35355338, %v663_v29  ;;  %v1452_v31 = vpop.f32.mrb[1].mxu1  ;;  %v1577_v29 = vld [vmem:[%s2047_s3] sm:$0xff]  }
 0x24d   : > { %v666_v32 = vpop.f32.mrb[2].mxu1  ;;  %1485 = vmatpush3.bf16.msra.mxu1 %v1577_v29  ;;  %v1578_v31 = vld [vmem:[%s2047_s3 + $0x8] sm:$0xff]   ;;  %s1981_s3 = scalar_lea.hbm %s2037_s13, %s1391_s21 }
 0x24e   : > { %v1453_v33 = vpop.f32.mrb[3].mxu1  ;;  %v670_v34 = vsel %vm510_vm2, %v669_v30, -inf  ;;  %1486 = vmatprep.subr.bf16.mxu1 %v1673_v1 }
 0x24f   : > { %671 = vmax.xlane.f32.xlu0 %v670_v34 }
 0x251   : > { %1487 = vmatpush3.bf16.msra.mxu1 %v1578_v31 }
 0x252   : > { %1500 = vmatprep.subr.bf16.mxu1 %v1673_v1 }
 0x253   : > { %v774_v35 = vpop.f32.mrb[4].mxu1 }
 0x254   : > { %v780_v36 = vmul.f32 0.35355338, %v774_v35  ;;  %v1464_v37 = vpop.f32.mrb[5].mxu1 }
 0x255   : > { %v777_v38 = vpop.f32.mrb[6].mxu1 }
 0x256   : > { %v1465_v39 = vpop.f32.mrb[7].mxu1  ;;  %v781_v40 = vsel %vm510_vm2, %v780_v36, -inf }
 0x257   : > { %782 = vmax.xlane.f32.xlu0 %v781_v40 }
 0x25b   : > { %v885_v41 = vpop.f32.mrb[8].mxu1 }
 0x25c   : > { %v1476_v42 = vpop.f32.mrb[9].mxu1  ;;  %680 = vrot.lane.b32.xlu1 %v1837_v10, %s1682_s22  ;;  %v891_v45 = vmul.f32 0.35355338, %v885_v41 }
 0x25d   : > { %v888_v43 = vpop.f32.mrb[10].mxu1 }
 0x25e   : > { %v1477_v44 = vpop.f32.mrb[11].mxu1  ;;  %v892_v46 = vsel %vm510_vm2, %v891_v45, -inf }
 0x26d   : > { %568 = vrot.lane.b32.xlu0 %v1837_v10, %s1683_s23  ;;  %s1687_s23 = smov 16  }
 0x271   : > { %902 = vrot.lane.b32.xlu0 %v1837_v10, %s1684_s24  ;;  %s1688_s24 = smov 24  }
 0x280   : > { %893 = vmax.xlane.f32.xlu1 %v892_v46 }
 0x291   : > { %791 = vrot.lane.b32.xlu1 %v1837_v10, %s1685_s30 }
 0x2d8   : > { %v560_v47 = vpop.xlane.xlu1 %559 }
 0x2d9   : > { %v561_v48 = vsub.f32 %v557_v24, %v560_v47 }
 0x2db   : > { %v562_v49 = vmul.f32 1.442695, %v561_v48 }
 0x2dc   : > { %v672_v50 = vpop.xlane.xlu0 %671  ;;  %v681_v59 = vpop.permute.xlu1 %680 }
 0x2dd   : > { %v673_v51 = vsub.f32 %v669_v30, %v672_v50  ;;  %1589 = vpow2.f32 %v562_v49  ;;  %v686_v63 = vsel %vm573_vm3, %v681_v59, 0 }
 0x2df   : > { %v674_v52 = vmul.f32 1.442695, %v673_v51 }
 0x2e1   : > { %1591 = vpow2.f32 %v674_v52 }
 0x2e4   : > { %v783_v53 = vpop.xlane.xlu0 %782 }
 0x2e5   : > { %v784_v54 = vsub.f32 %v780_v36, %v783_v53 }
 0x2e7   : > { %v785_v55 = vmul.f32 1.442695, %v784_v54  ;;  %v1590_v56 = vpop.eup %1589  ;;  %v1369_v54 = vld [vmem:[%s2028_s4] ss:$0 sm:$0xff] }
 0x2e8   : > { %v569_v57 = vpop.permute.xlu0 %568  ;;  %v567_v61 = vpack.c.bf16 %v1590_v56, %v1590_v56  ;;  %v564_v0 = vsel %vm510_vm2, %v1590_v56, 0.0 }
 0x2e9   : > { %1593 = vpow2.f32 %v785_v55  ;;  %v575_v58 = vsel %vm573_vm3, %v569_v57, 0 }
 0x2ea   : > { %1443 = vmatpush3.bf16.msra.mxu0 %v575_v58 }
 0x2eb   : > { %v1592_v60 = vpop.eup %1591  ;;  %1454 = vmatprep.subr.bf16.mxu0 %v1673_v1 }
 0x2ec   : > { %v676_v62 = vsel %vm510_vm2, %v1592_v60, 0.0  ;;  %v679_v4 = vpack.c.bf16 %v1592_v60, %v1592_v60  ;;  %v903_v11 = vpop.permute.xlu0 %902 }
 0x2ed   : > { %677 = vadd.xlane.f32.xlu1 %v676_v62  ;;  %1445 = vmatmul.mubr.msk.bf16.vlgmr.msra.gmra.mrb[8].mxu0 %vm510_vm2, %v567_v61  ;;  %v908_v13 = vsel %vm573_vm3, %v903_v11, 0  ;;  %v1586_v11 = vld [vmem:[%s2033_s9 + $0x28] sm:$0xff]  }
 0x2ee   : > { %1455 = vmatpush3.bf16.msra.mxu0 %v686_v63  ;;  %1456 = vmatprep.mubr.msk.bf16.mxu0 %vm1674_vm0, %v1673_v1 }
 0x2ef   : > { %1466 = vmatprep.subr.bf16.mxu0 %v1673_v1 }
 0x2f1   : > { %565 = vadd.xlane.f32.xlu1 %v564_v0 }
 0x2f3   : > { %v1594_v2 = vpop.eup %1593 }
 0x2f4   : > { %v787_v5 = vsel %vm510_vm2, %v1594_v2, 0.0  ;;  %v790_v12 = vpack.c.bf16 %v1594_v2, %v1594_v2 }
 0x2f5   : > { %788 = vadd.xlane.f32.xlu0 %v787_v5  ;;  %1457 = vmatmul.mubr.msk.bf16.vlgmr.msra.gmra.mrb[12].mxu0 %vm510_vm2, %v679_v4  ;;  %v1579_v5 = vld [vmem:[%s2031_s7] sm:$0xff]  }
 0x2f6   : > { %1468 = vmatprep.mubr.msk.bf16.mxu0 %vm1674_vm0, %v1673_v1 }
 0x30d   : > { %v894_v6 = vpop.xlane.xlu1 %893 }
 0x30e   : > { %v895_v7 = vsub.f32 %v891_v45, %v894_v6  ;;  %v1581_v6 = vld [vmem:[%s2033_s9] sm:$0xff]  }
 0x310   : > { %v896_v8 = vmul.f32 1.442695, %v895_v7  ;;  %v1582_v7 = vld [vmem:[%s2033_s9 + $0x8] sm:$0xff]  }
 0x311   : > { %v792_v9 = vpop.permute.xlu1 %791 }
 0x312   : > { %1595 = vpow2.f32 %v896_v8  ;;  %v797_v10 = vsel %vm573_vm3, %v792_v9, 0  ;;  %v1583_v8 = vld [vmem:[%s2033_s9 + $0x10] sm:$0xff]   ;;  %v1584_v9 = vld [vmem:[%s2033_s9 + $0x18] sm:$0xff]  }
 0x313   : > { %1467 = vmatpush3.bf16.msra.mxu0 %v797_v10  ;;  %v1585_v10 = vld [vmem:[%s2033_s9 + $0x20] sm:$0xff]  }
 0x314   : > { %1478 = vmatprep.subr.bf16.mxu0 %v1673_v1 }
 0x316   : > { %1469 = vmatmul.mubr.msk.bf16.vlgmr.msra.gmra.mrb[16].mxu0 %vm510_vm2, %v790_v12 }
 0x317   : > { %1479 = vmatpush3.bf16.msra.mxu0 %v908_v13  ;;  %1480 = vmatprep.mubr.msk.bf16.mxu0 %vm1674_vm0, %v1673_v1 }
 0x318   : > { %1492 = vmatprep.subr.bf16.mxu0 %v1673_v1 }
 0x31c   : > { %v1596_v14 = vpop.eup %1595 }
 0x31d   : > { %v898_v15 = vsel %vm510_vm2, %v1596_v14, 0.0  ;;  %v901_v16 = vpack.c.bf16 %v1596_v14, %v1596_v14 }
 0x31e   : > { %899 = vadd.xlane.f32.xlu0 %v898_v15 }
 0x31f   : > { %1481 = vmatmul.mubr.msk.bf16.vlgmr.msra.gmra.mrb[20].mxu0 %vm510_vm2, %v901_v16  ;;  %v1373_v16 = vld [vmem:[%s2029_s5] ss:$0 sm:$0xff] }
 0x320   : > { %1496 = vmatprep.mubr.msk.bf16.mxu0 %vm1674_vm0, %v1673_v1  ;;  %1493 = vmatpush3.bf16.msra.mxu0 %v1579_v5 }
 0x321   : > { %1494 = vmatprep.subr.bf16.mxu0 %v1673_v1 }
 0x37a   : > { %v678_v17 = vpop.xlane.xlu1 %677 }
 0x37b   : > { %1597 = vrcp.f32 %v678_v17 }
 0x37e   : > { %v566_v44 = vpop.xlane.xlu1 %565 }
 0x382   : > { %v789_v28 = vpop.xlane.xlu0 %788 }
 0x383   : > { %1599 = vrcp.f32 %v789_v28 }
 0x385   : > { %v1598_v22 = vpop.eup %1597 }
 0x38d   : > { %v1600_v32 = vpop.eup %1599 }
 0x3ab   : > { %v900_v30 = vpop.xlane.xlu0 %899 }
 0x3ac   : > { %1601 = vrcp.f32 %v900_v30 }
 0x3ad   : > { %1603 = vrcp.f32 %v566_v44 }
 0x3b6   : > { %v1602_v38 = vpop.eup %1601 }
 0x3b7   : > { %v1604_v45 = vpop.eup %1603 }
 0x3c0   : > { %v611_v18 = vpop.f32.mrb[8].mxu0 }
 0x3c1   : > { %v1446_v19 = vpop.f32.mrb[9].mxu0  ;;  %v618_v48 = vmul.f32 %v1604_v45, %v611_v18  ;;  %v1374_v18 = vld [vmem:[%s2030_s6] ss:$0 sm:$0xff] }
 0x3c2   : > { %v614_v20 = vpop.f32.mrb[10].mxu0 }
 0x3c3   : > { %v1447_v21 = vpop.f32.mrb[11].mxu0 }
 0x3c8   : > { %v722_v23 = vpop.f32.mrb[12].mxu0 }
 0x3c9   : > { %v729_v24 = vmul.f32 %v1598_v22, %v722_v23  ;;  %v1458_v25 = vpop.f32.mrb[13].mxu0  ;;  %v1587_v22 = vld [vmem:[%s2033_s9 + $0x30] sm:$0xff]   ;;  %v1588_v23 = vld [vmem:[%s2033_s9 + $0x38] sm:$0xff]  }
 0x3ca   : > { %v725_v26 = vpop.f32.mrb[14].mxu0 }
 0x3cb   : > { %953 = vrot.lane.b32.xlu0 %v729_v24, %s1686_s15  ;;  %v1459_v27 = vpop.f32.mrb[15].mxu0  ;;  %v1375_v24 = vld [vmem:[%s2032_s8] ss:$0 sm:$0xff] }
 0x3e9   : > { %v833_v33 = vpop.f32.mrb[16].mxu0 }
 0x3ea   : > { %v840_v34 = vmul.f32 %v1600_v32, %v833_v33  ;;  %v1470_v35 = vpop.f32.mrb[17].mxu0 }
 0x3eb   : > { %v836_v36 = vpop.f32.mrb[18].mxu0 }
 0x3ec   : > { %957 = vrot.lane.b32.xlu1 %v840_v34, %s1687_s23  ;;  %v1471_v37 = vpop.f32.mrb[19].mxu0  ;;  %s429_s23 = sand.u32 1, %s1663_s26  }
 0x3ed   : > { %s1279_s30 = scalar_lea.sflag [#allocation3], %s429_s23 }
 0x3f2   : > { %v944_v39 = vpop.f32.mrb[20].mxu0 }
 0x3f3   : > { %v951_v40 = vmul.f32 %v1602_v38, %v944_v39  ;;  %v1482_v41 = vpop.f32.mrb[21].mxu0 }
 0x3f4   : > { %v947_v42 = vpop.f32.mrb[22].mxu0 }
 0x3f5   : > { %961 = vrot.lane.b32.xlu1 %v951_v40, %s1688_s24  ;;  %v1483_v43 = vpop.f32.mrb[23].mxu0  ;;  %s1355_s24 = sshll.u32 %s429_s23, 3 }
 0x3f6   : > { %s431_s22 = scalar_lea.vmem [#allocation2], %s1355_s24  ;;  %s1613_s24 = sshll.u32 %s1689_s29, 4  ;;  %s1614_s24 = int_to_ptr.vmem [resolvable:$false] %s1613_s24 }
 0x3f7   : > { %s1292_s0 = sshll.u32 %s431_s22, 4  ;;  %s1615_s16 = scalar_lea.vmem %s1614_s24, 256  ;;  %s1983_s0 = int_to_ptr.vmem [resolvable:$true] %s1292_s0 }
 0x3f8   : > { %s1609_s15 = scalar_lea.vmem %s1983_s0, 128  ;;  %p1616_p0 = scmp.lt.s32.totalorder %s1983_s0, %s1614_s24 }
 0x3f9   : > { %p1610_p11 = scmp.ne.s32.totalorder %s1983_s0, %s1609_s15  ;;  %p1617_p1 = scmp.lt.s32.totalorder %s1615_s16, %s1609_s15 }
 0x3fb   : > { %p1611_p12 = pnand %p1610_p11, %p1798_p5  ;;  %p1618_p2 = por %p1617_p1, %p1616_p0 }
 0x3fd   : > { %p1612_p13 = pneg %p1611_p12 }
 0x3ff   : > { %p1619_p3 = pnand %p1618_p2, %p1612_p13 }
 0x43d   : > { %v954_v46 = vpop.permute.xlu0 %953 }
 0x43e   : > { %v964_v49 = vsel %vm510_vm2, %v618_v48, %v954_v46  ;;  %v1388_v48 = vld [vmem:[%s2035_s11] ss:$0 sm:$0xff] }
 0x45e   : > { %v958_v47 = vpop.permute.xlu1 %957 }
 0x45f   : > { %v966_v50 = vsel %vm965_vm4, %v964_v49, %v958_v47 }
 0x467   : > { %v962_v51 = vpop.permute.xlu1 %961 }
 0x468   : > { %v968_v52 = vsel %vm967_vm5, %v966_v50, %v962_v51  ;;  %v1389_v50 = vld [vmem:[%s2036_s12] ss:$0 sm:$0xff] }
 0x469   : > { %v969_v53 = vpack.c.bf16 %v968_v52, %v968_v52 }
 0x46b   : > { %1489 = vmatmul.mubr.msk.bf16.vlgmr.msra.gmra.mrb[12].mxu1 %vm462_vm1, %v969_v53 }
 0x46c   : > { %1516 = vmatprep.mubr.msk.bf16.mxu1 %vm1674_vm0, %v1673_v1  ;;  %1501 = vmatpush3.bf16.msra.mxu1 %v1581_v6 }
 0x46d   : > { %1502 = vmatprep.subr.bf16.mxu1 %v1673_v1 }
 0x470   : > { %1503 = vmatpush3.bf16.msra.mxu1 %v1582_v7 }
 0x471   : > { %1504 = vmatprep.subr.bf16.mxu1 %v1673_v1 }
 0x474   : > { %1505 = vmatpush3.bf16.msra.mxu1 %v1583_v8 }
 0x475   : > { %1506 = vmatprep.subr.bf16.mxu1 %v1673_v1 }
 0x478   : > { %1507 = vmatpush3.bf16.msra.mxu1 %v1584_v9 }
 0x479   : > { %1508 = vmatprep.subr.bf16.mxu1 %v1673_v1 }
 0x47c   : > { %1509 = vmatpush3.bf16.msra.mxu1 %v1585_v10 }
 0x47d   : > { %1510 = vmatprep.subr.bf16.mxu1 %v1673_v1 }
 0x480   : > { %1511 = vmatpush3.bf16.msra.mxu1 %v1586_v11 }
 0x481   : > { %1512 = vmatprep.subr.bf16.mxu1 %v1673_v1 }
 0x484   : > { %1513 = vmatpush3.bf16.msra.mxu1 %v1587_v22 }
 0x485   : > { %1514 = vmatprep.subr.bf16.mxu1 %v1673_v1  ;;  %v1379_v1 = vld [vmem:[%s2034_s10] ss:$0 sm:$0xff] }
 0x488   : > { %1515 = vmatpush3.bf16.msra.mxu1 %v1588_v23 }
 0x53e   : > { %v1030_v55 = vpop.f32.mrb[12].mxu1 }
 0x53f   : > { %v1031_v56 = vadd.f32 %v1369_v54, %v1030_v55  ;;  %v1490_v57 = vpop.f32.mrb[13].mxu1 }
 0x540   : > { %v1033_v58 = vpop.f32.mrb[14].mxu1 }
 0x541   : > { %v1491_v59 = vpop.f32.mrb[15].mxu1  ;;  %v1036_v60 = vadd.f32 %v1031_v56, %v1827_v3  ;;  %v1580_v3 = vld [vmem:[%s2031_s7 + $0x8] sm:$0xff]  }
 0x542   : > { %1495 = vmatpush3.bf16.msra.mxu0 %v1580_v3 }
 0x543   : > { %v1037_v61 = vsel %vm462_vm1, %v1036_v60, 0.0 }
 0x544   : > { %1038 = vadd.xlane.f32.xlu0 %v1037_v61 }
 0x5d1   : > { %v1039_v62 = vpop.xlane.xlu0 %1038 }
 0x5d2   : > { %v1041_v63 = vmul.f32 0.03125, %v1039_v62 }
 0x5d4   : > { %v1042_v0 = vsub.f32 %v1036_v60, %v1041_v63 }
 0x5d6   : > { %v1043_v2 = vmul.f32 %v1042_v0, %v1042_v0 }
 0x5d8   : > { %v1044_v4 = vsel %vm462_vm1, %v1043_v2, 0.0 }
 0x5d9   : > { %1045 = vadd.xlane.f32.xlu1 %v1044_v4 }
 0x666   : > { %v1046_v12 = vpop.xlane.xlu1 %1045 }
 0x667   : > { %v1047_v13 = vmul.f32 0.03125, %v1046_v12 }
 0x669   : > { %v1048_v14 = vadd.f32 1e-05, %v1047_v13 }
 0x66b   : > { %1605 = vrsqrt.f32 %v1048_v14 }
 0x675   : > { %v1606_v15 = vpop.eup %1605 }
 0x676   : > { %v1050_v17 = vmul.f32 %v1606_v15, %v1042_v0 }
 0x678   : > { %v1058_v19 = vmul.f32 %v1373_v16, %v1050_v17 }
 0x67a   : > { %v1066_v20 = vadd.f32 %v1374_v18, %v1058_v19 }
 0x67c   : > { %v1067_v21 = vpack.c.bf16 %v1066_v20, %v1066_v20 }
 0x67e   : > { %1497 = vmatmul.mubr.msk.bf16.vlgmr.msra.gmra.mrb[24].mxu0 %vm462_vm1, %v1067_v21 }
 0x751   : > { %v1128_v25 = vpop.f32.mrb[24].mxu0 }
 0x752   : > { %v1129_v26 = vadd.f32 %v1375_v24, %v1128_v25  ;;  %v1498_v27 = vpop.f32.mrb[25].mxu0 }
 0x753   : > { %v1131_v28 = vpop.f32.mrb[26].mxu0 }
 0x754   : > { %v1134_v29 = vmax.f32 %v1129_v26, 0.0  ;;  %v1499_v30 = vpop.f32.mrb[27].mxu0 }
 0x756   : > { %v1135_v31 = vpack.c.bf16 %v1134_v29, %v1134_v29 }
 0x758   : > { %1517 = vmatmul.mubr.bf16.vlgmr.msra.gmra.mrb[16].mxu1 %v1135_v31 }
 0x82b   : > { %v1241_v32 = vpop.f32.mrb[16].mxu1 }
 0x82c   : > { %v1242_v33 = vadd.f32 %v1379_v1, %v1241_v32  ;;  %v1518_v34 = vpop.f32.mrb[17].mxu1 }
 0x82d   : > { %v1244_v35 = vpop.f32.mrb[18].mxu1 }
 0x82e   : > { %v1519_v36 = vpop.f32.mrb[19].mxu1  ;;  %v1247_v37 = vadd.f32 %v1242_v33, %v1066_v20 }
 0x830   : > { %v1248_v38 = vsel %vm462_vm1, %v1247_v37, 0.0 }
 0x831   : > { %1249 = vadd.xlane.f32.xlu0 %v1248_v38 }
 0x8be   : > { %v1250_v39 = vpop.xlane.xlu0 %1249 }
 0x8bf   : > { %v1251_v40 = vmul.f32 0.03125, %v1250_v39 }
 0x8c1   : > { %v1252_v41 = vsub.f32 %v1247_v37, %v1251_v40 }
 0x8c3   : > { %v1253_v42 = vmul.f32 %v1252_v41, %v1252_v41 }
 0x8c5   : > { %v1254_v43 = vsel %vm462_vm1, %v1253_v42, 0.0 }
 0x8c6   : > { %1255 = vadd.xlane.f32.xlu0 %v1254_v43 }
 0x953   : > { %v1256_v44 = vpop.xlane.xlu0 %1255 }
 0x954   : > { %v1257_v45 = vmul.f32 0.03125, %v1256_v44 }
 0x956   : > { %v1258_v46 = vadd.f32 1e-05, %v1257_v45 }
 0x958   : > { %1607 = vrsqrt.f32 %v1258_v46 }
 0x962   : > { %v1608_v47 = vpop.eup %1607 }
 0x963   : > { %v1260_v49 = vmul.f32 %v1608_v47, %v1252_v41 }
 0x965   : > { %v1268_v51 = vmul.f32 %v1388_v48, %v1260_v49 }
 0x967   : > { %v1276_v52 = vadd.f32 %v1389_v50, %v1268_v51 }
 0x969   : > { %1277 = vst.msk [vmem:[%s431_s22] sm:$0xff] %vm462_vm1, %v1276_v52 }
 0x96a   : > { %1622 = shalt.err (!%p1619_p3)
}
 0x96b   : > { %s1623_s1 = scalar_lea.hbm %s1981_s3, 128  ;;  %s1627_s20 = scalar_lea.hbm %s2037_s13, 256 }
 0x96c   : > { %p1624_p4 = scmp.ne.s32.totalorder %s1981_s3, %s1623_s1  ;;  %p1628_p9 = scmp.lt.u32.totalorder %s1981_s3, %s2037_s13 }
 0x96d   : > { %p1629_p10 = scmp.lt.u32.totalorder %s1627_s20, %s1623_s1  ;;  %p1631_p12 = scmp.lt.u32.totalorder %s1623_s1, %s1981_s3 }
 0x96e   : > { %p1625_p7 = pnand %p1624_p4, %p1798_p5 }
 0x96f   : > { %p1630_p11 = por %p1629_p10, %p1628_p9 }
 0x970   : > { %p1626_p8 = pneg %p1625_p7 }
 0x971   : > { %p1632_p13 = por %p1631_p12, %p1630_p11 }
 0x973   : > { %p1633_p0 = pnand %p1632_p13, %p1626_p8 }
 0x975   : > { %1636 = shalt.err (!%p1633_p0)
}
 0x976   : > { %1520 = dma.vmem_to_hbm [thread:$0]  (%p1798_p5), %s1983_s0, 128, %s1981_s3, %s1279_s30  }
 0x977 PF: > { %p1526_p1 = scmp.ge.s32.totalorder %s1671_s28, 2  ;;  %s1304_s15 = sand.u32 1, %s1659_s25  }
 0x978   : > { %s1305_s29 = scalar_lea.sflag [#allocation3], %s1304_s15 }
 0x979   : > { %p1523_p2 = pnand %p1526_p1, %p1802_p6 }
 0x97b   : > { %1654 = dma.done.wait (!%p1523_p2), %s1305_s29, 128  }
 0x97c   : > { %1656 = vsyncadd (!%p1523_p2), %s1305_s29, 4294967168  ;;  %p23_p3 = scmp.ge.s32.totalorder %s1785_s14, 4   ;;  %s2048_s25 = smov %s1663_s26 }
 0x97d   : > { %s2049_s26 = smov %s1667_s27  ;;  %s2050_s27 = smov %s1796_s17 }
 0x97e   : > { %s2051_s28 = smov %s1785_s14  ;;  %25 = sbr.rel (!%p23_p3) target bundleno = 8 (0x8), region = 107 }
 0x985   :  { %1310 = vsyncpa [#allocation3], 1 }
 0x986   :  { %1312 = vsyncpa [#allocation3 + $0x1], 1 }

</bundles_post_ra>
